<compile_context>
chip_gen: v7x
topology: tpu7x:2x2x1
jax: 0.10.0
libtpu: 0.0.40
codegen_flags: <defaults>
</compile_context>

<pallas_src>
import functools

import jax
import jax.numpy as jnp
from jax.experimental import pallas as pl
from jax.experimental.pallas import tpu as pltpu

LAMBDA_SI = 0.5
LAMBDA_SEM = 0.2

_LANES = 128
_BLOCK_ROWS = 2048                 # sweep 1024 / 2048 / 4096
_VMEM_LIMIT = 32 * 1024 * 1024     # explicit scoped-VMEM limit (safe on v5e/v6e/v7x)


def _round_up(x, m):
    return ((x + m - 1) // m) * m


def _depth_loss_kernel(pred_ref, target_ref, sem_ref,
                       sq_ref, ld_ref, w_ref,
                       *, tm, rows, steps_per_core, needs_mask,
                       lambda_si, lambda_sem):
    del lambda_si, lambda_sem  # finalize happens in the wrapper
    c = pl.program_id(0)       # core / parallel axis
    j = pl.program_id(1)       # streaming axis

    @pl.when(j == 0)
    def _():
        sq_ref[...] = jnp.zeros_like(sq_ref)
        ld_ref[...] = jnp.zeros_like(ld_ref)
        w_ref[...] = jnp.zeros_like(w_ref)

    p = pred_ref[...].astype(jnp.float32)
    t = target_ref[...].astype(jnp.float32)
    s = sem_ref[...].astype(jnp.float32)

    if needs_mask:
        # Unclamped global block index; rows past `rows` (ragged tail of the
        # last block, or duplicated/overflow blocks) are neutralized *before*
        # the transcendentals so they contribute exactly 0 and never NaN/Inf.
        b = c * steps_per_core + j
        row_ids = (jax.lax.broadcasted_iota(jnp.int32, (tm, _LANES), 0)
                   + b * tm)
        mask = row_ids < rows
        p = jnp.where(mask, p, 1.0)
        t = jnp.where(mask, t, 1.0)
        s = jnp.where(mask, s, 0.0)

    log_diff = jnp.log(p) - jnp.log(t)
    sq = log_diff * log_diff
    w = jnp.clip(0.1 * s + 0.9, 0.5, 2.0)
    wad = w * jnp.abs(p - t)           # 0 on neutralized rows (|p - t| == 0)

    # Fold the (tm, 128) block to a single (8, 128) vreg-tile: leading-axis
    # sum is pure VPU element-wise adds (no XLU), then accumulate into the
    # resident output block (constant out index across j).
    nsub = tm // 8
    sq_ref[...] += sq.reshape(nsub, 8, _LANES).sum(axis=0)
    ld_ref[...] += log_diff.reshape(nsub, 8, _LANES).sum(axis=0)
    w_ref[...] += wad.reshape(nsub, 8, _LANES).sum(axis=0)


def _partial_sums_pallas(p2, t2, s2, rows, tm, input_buffers=None):
    """Run the streaming kernel; return (sum_sq, sum_ld, sum_w) scalars."""
    nb = pl.cdiv(rows, tm)
    num_cores = 2 if nb >= 2 else 1          # v7x dual-TC split; harmless on v5e/v6e
    spc = pl.cdiv(nb, num_cores)             # steps per core
    needs_mask = (rows % tm != 0) or (spc * num_cores != nb)
    last_block = nb - 1

    if spc * num_cores == nb:
        def in_map(c, j):
            return (c * spc + j, 0)
    else:
        # Overflow steps re-read the last valid block (DMA stays in-bounds);
        # their contribution is zeroed by the in-kernel mask.
        def in_map(c, j):
            return (jnp.minimum(c * spc + j, last_block), 0)

    spec_kwargs = {}
    if input_buffers is not None and input_buffers != 2:
        spec_kwargs["pipeline_mode"] = pl.Buffered(input_buffers)

    in_spec = pl.BlockSpec((tm, _LANES), in_map, **spec_kwargs)
    out_spec = pl.BlockSpec((8, _LANES), lambda c, j: (c, 0))
    out_sds = jax.ShapeDtypeStruct((num_cores * 8, _LANES), jnp.float32)

    kernel = functools.partial(
        _depth_loss_kernel,
        tm=tm, rows=rows, steps_per_core=spc, needs_mask=needs_mask,
        lambda_si=LAMBDA_SI, lambda_sem=LAMBDA_SEM)

    o_sq, o_ld, o_w = pl.pallas_call(
        kernel,
        out_shape=(out_sds, out_sds, out_sds),
        grid_spec=pltpu.PrefetchScalarGridSpec(
            num_scalar_prefetch=0,
            grid=(num_cores, spc),
            in_specs=[in_spec, in_spec, in_spec],
            out_specs=[out_spec, out_spec, out_spec],
        ),
        compiler_params=pltpu.CompilerParams(
            dimension_semantics=("parallel", "arbitrary"),
            vmem_limit_bytes=_VMEM_LIMIT),
    )(p2, t2, s2)

    # Tiny final cross-lane reductions (3 * num_cores * 8 * 128 f32) in JAX.
    return jnp.sum(o_sq), jnp.sum(o_ld), jnp.sum(o_w)


def depth_loss(pred, target, semantic_map,
               lambda_si=LAMBDA_SI, lambda_sem=LAMBDA_SEM,
               block_rows=_BLOCK_ROWS, input_buffers=None):
    """Scalar depth loss. pred/target/semantic_map: same-shape arrays (NCHW).

    semantic_map may be int8/uint8/bf16/f32 (upcast in-kernel); pred/target may
    be bf16 if the caller tolerates the log-precision loss.
    """
    assert pred.shape == target.shape == semantic_map.shape
    n = pred.size

    p = jnp.ravel(pred)
    t = jnp.ravel(target)
    s = jnp.ravel(semantic_map)

    rows = n // _LANES
    rem = n % _LANES
    main = rows * _LANES

    # <=127-element ragged tail handled with a tiny pure-JAX reduction
    # (no full-array jnp.pad copy).
    if rem:
        pt = p[main:].astype(jnp.float32)
        tt = t[main:].astype(jnp.float32)
        st = s[main:].astype(jnp.float32)
        ldt = jnp.log(pt) - jnp.log(tt)
        tail_sq = jnp.sum(ldt * ldt)
        tail_ld = jnp.sum(ldt)
        tail_w = jnp.sum(jnp.clip(0.1 * st + 0.9, 0.5, 2.0) * jnp.abs(pt - tt))
    else:
        tail_sq = tail_ld = tail_w = jnp.float32(0.0)

    if rows == 0:
        sum_sq, sum_ld, sum_w = tail_sq, tail_ld, tail_w
    else:
        if rem:
            p_m, t_m, s_m = p[:main], t[:main], s[:main]
        else:
            p_m, t_m, s_m = p, t, s          # no slice op in the common case
        p2 = p_m.reshape(rows, _LANES)       # free row-major reshape
        t2 = t_m.reshape(rows, _LANES)
        s2 = s_m.reshape(rows, _LANES)

        tm = min(block_rows, _round_up(rows, 8))
        k_sq, k_ld, k_w = _partial_sums_pallas(
            p2, t2, s2, rows, tm, input_buffers=input_buffers)
        sum_sq = k_sq + tail_sq
        sum_ld = k_ld + tail_ld
        sum_w = k_w + tail_w

    inv_n = 1.0 / float(n)
    mean_sq = sum_sq * inv_n
    mean_ld = sum_ld * inv_n
    sem_loss = sum_w * inv_n
    # Clamp at 0 to avoid NaN when log_diff is ~constant (deviates from torch,
    # which would return NaN on a slightly negative argument).
    si_arg = jnp.maximum(mean_sq - lambda_si * mean_ld * mean_ld, 0.0)
    return jnp.sqrt(si_arg) + lambda_sem * sem_loss


def _depth_loss_ref(pred, target, semantic_map,
                    lambda_si=LAMBDA_SI, lambda_sem=LAMBDA_SEM):
    log_diff = jnp.log(pred) - jnp.log(target)
    si_loss = jnp.sqrt(jnp.mean(log_diff ** 2)
                       - lambda_si * jnp.mean(log_diff) ** 2)
    w = jnp.clip(0.1 * semantic_map + 0.9, 0.5, 2.0)
    sem_loss = jnp.mean(w * jnp.abs(pred - target))
    return si_loss + lambda_sem * sem_loss


if __name__ == "__main__":
    key = jax.random.PRNGKey(0)
    k1, k2, k3 = jax.random.split(key, 3)

    B, C, H, W = 2, 4, 16, 16  # NCHW, like the PyTorch module's inputs
    # Depths must be positive (log); semantic map is a small integer field,
    # passed as int8 to cut HBM traffic (kernel upcasts to f32).
    pred = jax.random.uniform(k1, (B, C, H, W), jnp.float32, 0.1, 10.0)
    target = jax.random.uniform(k2, (B, C, H, W), jnp.float32, 0.1, 10.0)
    semantic_map = jax.random.randint(k3, (B, C, H, W), 0, 8).astype(jnp.int8)

    loss = jax.block_until_ready(depth_loss(pred, target, semantic_map))
    ref = jax.block_until_ready(
        _depth_loss_ref(pred, target, semantic_map.astype(jnp.float32)))

    assert jnp.allclose(loss, ref, rtol=1e-5, atol=1e-5), (loss, ref)
    print("KERNEL_OK")
</pallas_src>

<mosaic_0001>
module attributes {stable_mosaic.version = 11 : i64} {
  func.func @_depth_loss_kernel(%arg0: i32, %arg1: i32, %arg2: memref<16x128xf32, #tpu.memory_space<vmem>>, %arg3: memref<16x128xf32, #tpu.memory_space<vmem>>, %arg4: memref<16x128xi8, #tpu.memory_space<vmem>>, %arg5: memref<8x128xf32, #tpu.memory_space<vmem>>, %arg6: memref<8x128xf32, #tpu.memory_space<vmem>>, %arg7: memref<8x128xf32, #tpu.memory_space<vmem>>) attributes {dimension_semantics = [#tpu.dimension_semantics<parallel>, #tpu.dimension_semantics<arbitrary>], iteration_bounds = array<i64: 1, 1>, scalar_prefetch = 0 : i64, scratch_operands = 0 : i64, tpu.core_type = #tpu.core_type<tc>, window_params = [{transform_indices = @transform_0, window_bounds = array<i64: 16, 128>}, {transform_indices = @transform_1, window_bounds = array<i64: 16, 128>}, {transform_indices = @transform_2, window_bounds = array<i64: 16, 128>}, {transform_indices = @transform_3, window_bounds = array<i64: 8, 128>}, {transform_indices = @transform_4, window_bounds = array<i64: 8, 128>}, {transform_indices = @transform_5, window_bounds = array<i64: 8, 128>}]} {
    %c0_i32 = arith.constant 0 : i32
    %0 = arith.cmpi eq, %arg1, %c0_i32 : i32
    %1 = arith.extui %0 : i1 to i32
    %c0_i32_0 = arith.constant 0 : i32
    %2 = arith.cmpi ne, %1, %c0_i32_0 : i32
    scf.if %2 {
      %cst_24 = arith.constant 0.000000e+00 : f32
      %37 = vector.broadcast %cst_24 : f32 to vector<8x128xf32>
      %c0_25 = arith.constant 0 : index
      %c0_26 = arith.constant 0 : index
      %38 = vector.load %arg5[%c0_25, %c0_26] : memref<8x128xf32, #tpu.memory_space<vmem>>, vector<8x128xf32>
      tpu.vector_store %arg5[%c0_25, %c0_26], %37 {strides = array<i32>} : memref<8x128xf32, #tpu.memory_space<vmem>>, vector<8x128xf32>,
      %cst_27 = arith.constant 0.000000e+00 : f32
      %39 = vector.broadcast %cst_27 : f32 to vector<8x128xf32>
      %c0_28 = arith.constant 0 : index
      %c0_29 = arith.constant 0 : index
      %40 = vector.load %arg6[%c0_28, %c0_29] : memref<8x128xf32, #tpu.memory_space<vmem>>, vector<8x128xf32>
      tpu.vector_store %arg6[%c0_28, %c0_29], %39 {strides = array<i32>} : memref<8x128xf32, #tpu.memory_space<vmem>>, vector<8x128xf32>,
      %cst_30 = arith.constant 0.000000e+00 : f32
      %41 = vector.broadcast %cst_30 : f32 to vector<8x128xf32>
      %c0_31 = arith.constant 0 : index
      %c0_32 = arith.constant 0 : index
      %42 = vector.load %arg7[%c0_31, %c0_32] : memref<8x128xf32, #tpu.memory_space<vmem>>, vector<8x128xf32>
      tpu.vector_store %arg7[%c0_31, %c0_32], %41 {strides = array<i32>} : memref<8x128xf32, #tpu.memory_space<vmem>>, vector<8x128xf32>,
    } else {
    }
    %c0 = arith.constant 0 : index
    %c0_1 = arith.constant 0 : index
    %3 = vector.load %arg2[%c0, %c0_1] : memref<16x128xf32, #tpu.memory_space<vmem>>, vector<16x128xf32>
    %c0_2 = arith.constant 0 : index
    %c0_3 = arith.constant 0 : index
    %4 = vector.load %arg3[%c0_2, %c0_3] : memref<16x128xf32, #tpu.memory_space<vmem>>, vector<16x128xf32>
    %c0_4 = arith.constant 0 : index
    %c0_5 = arith.constant 0 : index
    %5 = vector.load %arg4[%c0_4, %c0_5] : memref<16x128xi8, #tpu.memory_space<vmem>>, vector<16x128xi8>
    %6 = arith.sitofp %5 : vector<16x128xi8> to vector<16x128xf32>
    %7 = math.log %3 : vector<16x128xf32>
    %8 = math.log %4 : vector<16x128xf32>
    %9 = arith.subf %7, %8 : vector<16x128xf32>
    %10 = arith.mulf %9, %9 : vector<16x128xf32>
    %cst = arith.constant 1.000000e-01 : f32
    %11 = vector.broadcast %cst : f32 to vector<16x128xf32>
    %12 = arith.mulf %11, %6 : vector<16x128xf32>
    %cst_6 = arith.constant 0.899999976 : f32
    %13 = vector.broadcast %cst_6 : f32 to vector<16x128xf32>
    %14 = arith.addf %12, %13 : vector<16x128xf32>
    %cst_7 = arith.constant 5.000000e-01 : f32
    %cst_8 = arith.constant 2.000000e+00 : f32
    %15 = vector.broadcast %cst_7 : f32 to vector<16x128xf32>
    %16 = arith.maximumf %15, %14 : vector<16x128xf32>
    %17 = vector.broadcast %cst_8 : f32 to vector<16x128xf32>
    %18 = arith.minimumf %17, %16 : vector<16x128xf32>
    %19 = arith.subf %3, %4 : vector<16x128xf32>
    %20 = math.absf %19 : vector<16x128xf32>
    %21 = arith.mulf %18, %20 : vector<16x128xf32>
    %c0_9 = arith.constant 0 : index
    %c0_10 = arith.constant 0 : index
    %22 = vector.load %arg5[%c0_9, %c0_10] : memref<8x128xf32, #tpu.memory_space<vmem>>, vector<8x128xf32>
    %23 = vector.shape_cast %10 : vector<16x128xf32> to vector<2x8x128xf32>
    %cst_11 = arith.constant dense<0.000000e+00> : vector<8x128xf32>
    %24 = vector.multi_reduction <add>, %23, %cst_11 [0] : vector<2x8x128xf32> to vector<8x128xf32>
    %25 = arith.addf %22, %24 : vector<8x128xf32>
    %c0_12 = arith.constant 0 : index
    %c0_13 = arith.constant 0 : index
    %26 = vector.load %arg5[%c0_12, %c0_13] : memref<8x128xf32, #tpu.memory_space<vmem>>, vector<8x128xf32>
    tpu.vector_store %arg5[%c0_12, %c0_13], %25 {strides = array<i32>} : memref<8x128xf32, #tpu.memory_space<vmem>>, vector<8x128xf32>,
    %c0_14 = arith.constant 0 : index
    %c0_15 = arith.constant 0 : index
    %27 = vector.load %arg6[%c0_14, %c0_15] : memref<8x128xf32, #tpu.memory_space<vmem>>, vector<8x128xf32>
    %28 = vector.shape_cast %9 : vector<16x128xf32> to vector<2x8x128xf32>
    %cst_16 = arith.constant dense<0.000000e+00> : vector<8x128xf32>
    %29 = vector.multi_reduction <add>, %28, %cst_16 [0] : vector<2x8x128xf32> to vector<8x128xf32>
    %30 = arith.addf %27, %29 : vector<8x128xf32>
    %c0_17 = arith.constant 0 : index
    %c0_18 = arith.constant 0 : index
    %31 = vector.load %arg6[%c0_17, %c0_18] : memref<8x128xf32, #tpu.memory_space<vmem>>, vector<8x128xf32>
    tpu.vector_store %arg6[%c0_17, %c0_18], %30 {strides = array<i32>} : memref<8x128xf32, #tpu.memory_space<vmem>>, vector<8x128xf32>,
    %c0_19 = arith.constant 0 : index
    %c0_20 = arith.constant 0 : index
    %32 = vector.load %arg7[%c0_19, %c0_20] : memref<8x128xf32, #tpu.memory_space<vmem>>, vector<8x128xf32>
    %33 = vector.shape_cast %21 : vector<16x128xf32> to vector<2x8x128xf32>
    %cst_21 = arith.constant dense<0.000000e+00> : vector<8x128xf32>
    %34 = vector.multi_reduction <add>, %33, %cst_21 [0] : vector<2x8x128xf32> to vector<8x128xf32>
    %35 = arith.addf %32, %34 : vector<8x128xf32>
    %c0_22 = arith.constant 0 : index
    %c0_23 = arith.constant 0 : index
    %36 = vector.load %arg7[%c0_22, %c0_23] : memref<8x128xf32, #tpu.memory_space<vmem>>, vector<8x128xf32>
    tpu.vector_store %arg7[%c0_22, %c0_23], %35 {strides = array<i32>} : memref<8x128xf32, #tpu.memory_space<vmem>>, vector<8x128xf32>,
    return
  }
  func.func @transform_0(%arg0: i32, %arg1: i32) -> (i32, i32) {
    %c1_i32 = arith.constant 1 : i32
    %0 = arith.muli %arg0, %c1_i32 : i32
    %1 = arith.addi %0, %arg1 : i32
    %c0_i32 = arith.constant 0 : i32
    %c0_i32_0 = arith.constant 0 : i32
    return %1, %c0_i32 : i32, i32
  }
  func.func @transform_1(%arg0: i32, %arg1: i32) -> (i32, i32) {
    %c1_i32 = arith.constant 1 : i32
    %0 = arith.muli %arg0, %c1_i32 : i32
    %1 = arith.addi %0, %arg1 : i32
    %c0_i32 = arith.constant 0 : i32
    %c0_i32_0 = arith.constant 0 : i32
    return %1, %c0_i32 : i32, i32
  }
  func.func @transform_2(%arg0: i32, %arg1: i32) -> (i32, i32) {
    %c1_i32 = arith.constant 1 : i32
    %0 = arith.muli %arg0, %c1_i32 : i32
    %1 = arith.addi %0, %arg1 : i32
    %c0_i32 = arith.constant 0 : i32
    %c0_i32_0 = arith.constant 0 : i32
    return %1, %c0_i32 : i32, i32
  }
  func.func @transform_3(%arg0: i32, %arg1: i32) -> (i32, i32) {
    %c0_i32 = arith.constant 0 : i32
    %c0_i32_0 = arith.constant 0 : i32
    return %arg0, %c0_i32 : i32, i32
  }
  func.func @transform_4(%arg0: i32, %arg1: i32) -> (i32, i32) {
    %c0_i32 = arith.constant 0 : i32
    %c0_i32_0 = arith.constant 0 : i32
    return %arg0, %c0_i32 : i32, i32
  }
  func.func @transform_5(%arg0: i32, %arg1: i32) -> (i32, i32) {
    %c0_i32 = arith.constant 0 : i32
    %c0_i32_0 = arith.constant 0 : i32
    return %arg0, %c0_i32 : i32, i32
  }
}

</mosaic_0001>

<bundles_post_ra>
// kernel: tpu_custom_call.1
= control target key start
LH: loop header
LB: loop body
LE: loop exit
PB: predicated region body
PF: predicated region fallthrough
CT: control target
= control target key end

     0   :  { %11 = vsyncpa [#allocation3], 0  ;;  %s437_s0 = inlined_call_operand.hbm [shape: f32[16,128], index: 0, kind: input, shape index: {}]   ;;  %s438_s1 = inlined_call_operand.hbm [shape: f32[16,128], index: 1, kind: input, shape index: {}]   ;;  %s439_s2 = inlined_call_operand.vmem [shape: s8[16,128], index: 2, kind: input, shape index: {}]   ;;  %s440_s3 = inlined_call_operand.hbm [shape: f32[8,128], index: 3, kind: output, shape index: {0}]   ;;  %s441_s4 = inlined_call_operand.hbm [shape: f32[8,128], index: 4, kind: output, shape index: {1}]   ;;  %s442_s5 = inlined_call_operand.hbm [shape: f32[8,128], index: 5, kind: output, shape index: {2}]  }
   0x1   :  { %12 = vsyncpa [#allocation6], 0 }
   0x2   :  { %13 = vsyncpa [#allocation4], 0 }
   0x3   :  { %14 = vsyncpa [#allocation9], 0  ;;  %s323_s18 = smov [#allocation2]   ;;  %s205_s22 = scalar_lea.hbm %s437_s0, 256 }
   0x4   :  { %s24_s19 = sshll.u32 %s323_s18, 4  ;;  %p206_p0 = scmp.ne.s32.totalorder %s437_s0, %s205_s22  ;;  %s25_s19 = int_to_ptr.vmem [resolvable:$true] %s24_s19 }
   0x5   :  { %p209_p1 = scmp.lt.u32.totalorder %s205_s22, %s437_s0 }
   0x7   :  { %p211_p2 = pnand %p209_p1, %p206_p0 }
   0x9   :  { %214 = shalt.err (!%p211_p2)
}
   0xa   :  { %s215_s27 = scalar_lea.vmem %s25_s19, 256  ;;  %p220_p4 = scmp.lt.s32.totalorder %s25_s19, %s25_s19 }
   0xb   :  { %p216_p3 = scmp.ne.s32.totalorder %s25_s19, %s215_s27  ;;  %p221_p5 = scmp.lt.s32.totalorder %s215_s27, %s215_s27 }
   0xd   :  { %p222_p6 = por %p221_p5, %p220_p4 }
   0xf   :  { %p223_p7 = pnand %p222_p6, %p216_p3 }
  0x11   :  { %226 = shalt.err (!%p223_p7)
}
  0x12   :  { %s324_s28 = smov 128   ;;  %s325_s29 = smov 8  }
  0x13   :  { %30 = dma.hbm_to_vmem [thread:$0]  %s437_s0, 256, %s25_s19, [#allocation3], %s324_s28, %s324_s28, %s325_s29  }
  0x14   :  { %s326_s7 = smov [#allocation5]   ;;  %s227_s11 = scalar_lea.hbm %s438_s1, 256 }
  0x15   :  { %s40_s8 = sshll.u32 %s326_s7, 4  ;;  %p228_p8 = scmp.ne.s32.totalorder %s438_s1, %s227_s11  ;;  %s41_s8 = int_to_ptr.vmem [resolvable:$true] %s40_s8 }
  0x16   :  { %p231_p9 = scmp.lt.u32.totalorder %s227_s11, %s438_s1 }
  0x18   :  { %p233_p10 = pnand %p231_p9, %p228_p8 }
  0x1a   :  { %236 = shalt.err (!%p233_p10)
}
  0x1b   :  { %s237_s16 = scalar_lea.vmem %s41_s8, 256  ;;  %p242_p12 = scmp.lt.s32.totalorder %s41_s8, %s41_s8 }
  0x1c   :  { %p238_p11 = scmp.ne.s32.totalorder %s41_s8, %s237_s16  ;;  %p243_p13 = scmp.lt.s32.totalorder %s237_s16, %s237_s16 }
  0x1e   :  { %p244_p0 = por %p243_p13, %p242_p12 }
  0x20   :  { %p245_p1 = pnand %p244_p0, %p238_p11 }
  0x22   :  { %248 = shalt.err (!%p245_p1)
}
  0x23   :  { %46 = dma.hbm_to_vmem [thread:$0]  %s438_s1, 256, %s41_s8, [#allocation6], %s324_s28, %s324_s28, %s325_s29  }
  0x24   :  { %315 = dma.done.wait [#allocation3], 256  }
  0x25   :  { %316 = vsyncadd [#allocation3], 4294967040 }
  0x26   :  { %317 = dma.done.wait [#allocation6], 256  }
  0x27   :  { %318 = vsyncadd [#allocation6], 4294967040  ;;  %v88_v0 = vld [vmem:[#allocation2] sm:$0xff]  ;;  %v89_v1 = vld [vmem:[#allocation2 + $0x8] sm:$0xff]  ;;  %s327_s1 = smov [#allocation8]   ;;  %s328_s20 = smov [#allocation10]  }
  0x28   :  { %v90_v2 = vld [vmem:[#allocation5] sm:$0xff]  ;;  %v91_v3 = vld [vmem:[#allocation5 + $0x8] sm:$0xff]  ;;  %197 = vlog2.f32 %v88_v0  ;;  %v186_v4 = vld [vmem:[%s439_s2] sm:$0xf]   ;;  %s152_s2 = sshll.u32 %s327_s1, 4  ;;  %s162_s21 = sshll.u32 %s328_s20, 4  ;;  %s153_s2 = int_to_ptr.vmem [resolvable:$true] %s152_s2  ;;  %s387_s21 = int_to_ptr.vmem [resolvable:$true] %s162_s21 }
  0x29   :  { %199 = vlog2.f32 %v89_v1  ;;  %v187_v5 = vunpack.c.0.s8 %v186_v4  ;;  %v188_v6 = vunpack.c.1.s8 %v186_v4  ;;  %v118_v11 = vsub.f32 %v88_v0, %v90_v2  ;;  %s329_s22 = smov [#allocation7]   ;;  %s249_s24 = scalar_lea.vmem %s153_s2, 128 }
  0x2a   :  { %201 = vlog2.f32 %v90_v2  ;;  %v119_v12 = vsub.f32 %v89_v1, %v91_v3  ;;  %s142_s23 = sshll.u32 %s329_s22, 4  ;;  %p250_p2 = scmp.ne.s32.totalorder %s153_s2, %s249_s24  ;;  %s389_s23 = int_to_ptr.vmem [resolvable:$true] %s142_s23 }
  0x2b   :  { %203 = vlog2.f32 %v91_v3  ;;  %v96_v7 = vcvt.s32.f32 %v187_v5  ;;  %v97_v8 = vcvt.s32.f32 %v188_v6  ;;  %v120_v17 = vand.u32 2147483647, %v118_v11  ;;  %p254_p3 = scmp.lt.s32.totalorder %s153_s2, %s153_s2  ;;  %p255_p4 = scmp.lt.s32.totalorder %s249_s24, %s249_s24 }
  0x2c   :  { %v121_v18 = vand.u32 2147483647, %v119_v12 }
  0x2d   :  { %v110_v9 = vmul.f32 0.1, %v96_v7  ;;  %v111_v10 = vmul.f32 0.1, %v97_v8  ;;  %p256_p5 = por %p255_p4, %p254_p3 }
  0x2f   :  { %v112_v13 = vadd.f32 0.9, %v110_v9  ;;  %v113_v14 = vadd.f32 0.9, %v111_v10  ;;  %p257_p6 = pnand %p256_p5, %p250_p2 }
  0x31   :  { %v114_v15 = vmax.f32 %v112_v13, 0.5  ;;  %v115_v16 = vmax.f32 %v113_v14, 0.5 }
  0x32   :  { %v198_v19 = vpop.eup %197 }
  0x33   :  { %v200_v20 = vpop.eup %199  ;;  %v99_v21 = vmul.f32 0.6931472, %v198_v19  ;;  %v116_v22 = vmin.f32 %v114_v15, 2.0  ;;  %v117_v23 = vmin.f32 %v115_v16, 2.0 }
  0x34   :  { %v202_v24 = vpop.eup %201  ;;  %v101_v25 = vmul.f32 0.6931472, %v200_v20 }
  0x35   :  { %v204_v26 = vpop.eup %203  ;;  %v103_v27 = vmul.f32 0.6931472, %v202_v24  ;;  %v122_v28 = vmul.f32 %v120_v17, %v116_v22  ;;  %v123_v29 = vmul.f32 %v121_v18, %v117_v23 }
  0x36   :  { %v105_v30 = vmul.f32 0.6931472, %v204_v26 }
  0x37   :  { %v106_v31 = vsub.f32 %v99_v21, %v103_v27  ;;  %v133_v32 = vadd.f32 %v123_v29, %v122_v28 }
  0x38   :  { %v107_v33 = vsub.f32 %v101_v25, %v105_v30 }
  0x39   :  { %v108_v34 = vmul.f32 %v106_v31, %v106_v31  ;;  %135 = vst [vmem:[#allocation10] sm:$0xff] %v133_v32 }
  0x3a   :  { %v129_v35 = vadd.f32 %v107_v33, %v106_v31  ;;  %v109_v36 = vmul.f32 %v107_v33, %v107_v33 }
  0x3c   :  { %v125_v37 = vadd.f32 %v109_v36, %v108_v34  ;;  %131 = vst [vmem:[#allocation8] sm:$0xff] %v129_v35 }
  0x3d   :  { %260 = shalt.err (!%p257_p6)
}
  0x3e   :  { %s261_s27 = scalar_lea.hbm %s441_s4, 128 }
  0x3f   :  { %p262_p7 = scmp.ne.s32.totalorder %s441_s4, %s261_s27  ;;  %p265_p8 = scmp.lt.u32.totalorder %s261_s27, %s441_s4 }
  0x41   :  { %p267_p9 = pnand %p265_p8, %p262_p7 }
  0x43   :  { %270 = shalt.err (!%p267_p9)
}
  0x44   :  { %155 = dma.vmem_to_hbm [thread:$0]  %s153_s2, 128, %s441_s4, [#allocation9]   ;;  %127 = vst [vmem:[#allocation7] sm:$0xff] %v125_v37 }
  0x45   :  { %s271_s9 = scalar_lea.vmem %s387_s21, 128  ;;  %p276_p11 = scmp.lt.s32.totalorder %s387_s21, %s387_s21 }
  0x46   :  { %p272_p10 = scmp.ne.s32.totalorder %s387_s21, %s271_s9  ;;  %p277_p12 = scmp.lt.s32.totalorder %s271_s9, %s271_s9 }
  0x48   :  { %p278_p13 = por %p277_p12, %p276_p11 }
  0x4a   :  { %p279_p0 = pnand %p278_p13, %p272_p10 }
  0x4c   :  { %282 = shalt.err (!%p279_p0)
}
  0x4d   :  { %s283_s12 = scalar_lea.hbm %s442_s5, 128 }
  0x4e   :  { %p284_p1 = scmp.ne.s32.totalorder %s442_s5, %s283_s12  ;;  %p287_p2 = scmp.lt.u32.totalorder %s283_s12, %s442_s5 }
  0x50   :  { %p289_p3 = pnand %p287_p2, %p284_p1 }
  0x52   :  { %292 = shalt.err (!%p289_p3)
}
  0x53   :  { %165 = dma.vmem_to_hbm [thread:$0]  %s387_s21, 128, %s442_s5, [#allocation9]  }
  0x54   :  { %s293_s17 = scalar_lea.vmem %s389_s23, 128  ;;  %p298_p5 = scmp.lt.s32.totalorder %s389_s23, %s389_s23 }
  0x55   :  { %p294_p4 = scmp.ne.s32.totalorder %s389_s23, %s293_s17  ;;  %p299_p6 = scmp.lt.s32.totalorder %s293_s17, %s293_s17 }
  0x57   :  { %p300_p7 = por %p299_p6, %p298_p5 }
  0x59   :  { %p301_p8 = pnand %p300_p7, %p294_p4 }
  0x5b   :  { %304 = shalt.err (!%p301_p8)
}
  0x5c   :  { %s305_s1 = scalar_lea.hbm %s440_s3, 128 }
  0x5d   :  { %p306_p9 = scmp.ne.s32.totalorder %s440_s3, %s305_s1  ;;  %p309_p10 = scmp.lt.u32.totalorder %s305_s1, %s440_s3 }
  0x5f   :  { %p311_p11 = pnand %p309_p10, %p306_p9 }
  0x61   :  { %314 = shalt.err (!%p311_p11)
}
  0x62   :  { %145 = dma.vmem_to_hbm [thread:$0]  %s389_s23, 128, %s440_s3, [#allocation4]  }
  0x63   :  { %319 = dma.done.wait [#allocation4], 128  }
  0x64   :  { %320 = vsyncadd [#allocation4], 4294967168 }
  0x65   :  { %321 = dma.done.wait [#allocation9], 256  }
  0x66   :  { %322 = vsyncadd [#allocation9], 4294967040 }
  0x67   :  { %175 = vsyncpa [#allocation3], 1 }
  0x68   :  { %176 = vsyncpa [#allocation6], 1 }
  0x69   :  { %177 = vsyncpa [#allocation4], 1 }
  0x6a   :  { %178 = vsyncpa [#allocation9], 1 }

</bundles_post_ra>
